<compile_context>
chip_gen: v5e
topology: v5e:2x2
jax: 0.10.0
libtpu: 0.0.40
codegen_flags: <defaults>
</compile_context>

<pallas_src>
import functools
import math
from typing import NamedTuple, Optional

import jax
import jax.numpy as jnp
import numpy as np
from jax.experimental import pallas as pl
from jax.experimental.pallas import tpu as pltpu


# ---------------------------------------------------------------------------
# Kernel bodies.
# ---------------------------------------------------------------------------
def _elastic_kernel_fullk(w_ref, x_ref, o_ref):
    """out_tile = W_tile(tm, Kp) @ X_tile(Kp, tl); full K per block, no scratch."""
    o_ref[...] = jnp.dot(
        w_ref[...], x_ref[...], preferred_element_type=jnp.float32
    ).astype(o_ref.dtype)


def _elastic_kernel_ksplit(w_ref, x_ref, o_ref, acc_ref, *, tm, tk, causal):
    """K-tiled matmul with f32 VMEM accumulator.  Grid = (Mi, B, Lj, Kk)."""
    k = pl.program_id(3)

    @pl.when(k == 0)
    def _init():
        acc_ref[...] = jnp.zeros_like(acc_ref)

    def _dot():
        acc_ref[...] += jnp.dot(
            w_ref[...], x_ref[...], preferred_element_type=jnp.float32
        )

    if causal:
        # W is pre-masked (tril) in the wrapper; tiles strictly above the
        # diagonal are all-zero -> skip the MXU work entirely.
        row0 = pl.program_id(0) * tm
        col0 = k * tk
        pl.when(row0 + tm > col0)(_dot)
    else:
        _dot()

    @pl.when(k == pl.num_programs(3) - 1)
    def _finalize():
        o_ref[...] = acc_ref[...].astype(o_ref.dtype)


# ---------------------------------------------------------------------------
# Tiling / VMEM budget helpers.
# ---------------------------------------------------------------------------
def _round_up(a, b):
    return -(-a // b) * b


def _split_even(dim, max_tile, align):
    """Split `dim` into equal-ish aligned tiles no larger than ~max_tile.

    Returns (tile, padded_dim) with tile a multiple of `align`, padded_dim a
    multiple of tile, and minimal over-padding (never rounds `dim` up to a
    whole multiple of the *requested* tile).
    """
    max_tile = _round_up(max(max_tile, align), align)
    if dim <= max_tile:
        t = _round_up(dim, align)
        return t, t
    n = -(-dim // max_tile)                  # number of tiles
    t = _round_up(-(-dim // n), align)
    return t, t * n


def _default_budgets():
    """(block_budget_bytes, vmem_limit_bytes) derived from real VMEM size."""
    try:
        cap = pltpu.get_tpu_info().vmem_capacity_bytes
    except Exception:
        cap = 64 * 1024 * 1024               # v7x-safe fallback
    limit = min(int(cap * 3 / 4), 96 * 1024 * 1024)   # leave compiler headroom
    budget = int(limit * 0.75)                         # double-buffered blocks
    return budget, limit


class _Config(NamedTuple):
    tm: int
    tk: int
    tl: int
    Mp: int
    Kp: int
    Lp: int
    k_steps: int


def _choose_tiles(M, K, L, cbytes, obytes, *, block_m=None, block_l=None,
                  block_k=None, budget=36 * 1024 * 1024):
    m_align = 16 if cbytes == 2 else 8       # bf16 packs 16 rows per sublane tile

    # L tile: full L when it fits a lane tile (no padding), else ~1024-wide
    # balanced tiles (multiples of 128).
    l_max = block_l if block_l is not None else 1024
    if L <= l_max:
        tl, Lp = L, L
    else:
        tl, Lp = _split_even(L, l_max, 128)

    def fits(tm, tk, with_acc):
        blocks = (tm * tk * cbytes            # W block
                  + tk * tl * cbytes          # X block
                  + tm * tl * obytes) * 2     # out block; all double-buffered
        if with_acc:
            blocks += tm * tl * 4             # f32 accumulator scratch
        return blocks <= budget

    Kp_full = _round_up(K, 128)
    force_split = (block_k is not None
                   and _round_up(block_k, 128) < Kp_full)

    # ---- Path A: full K in one block (no accumulator, no K grid axis) ----
    if not force_split:
        tm_req = block_m if block_m is not None else M
        tm, Mp = _split_even(M, tm_req, m_align)
        while tm > m_align and not fits(tm, Kp_full, False):
            tm, Mp = _split_even(M, max(m_align, tm // 2), m_align)
        if fits(tm, Kp_full, False):
            return _Config(tm, Kp_full, tl, Mp, Kp_full, Lp, 1)

    # ---- Path B: split K, accumulate in f32 VMEM scratch ----
    tk_req = block_k if block_k is not None else 512
    tk, Kp = _split_even(K, tk_req, 128)
    tm_req = block_m if block_m is not None else 512
    tm, Mp = _split_even(M, tm_req, m_align)
    while tm > m_align and not fits(tm, tk, True):
        tm, Mp = _split_even(M, max(m_align, tm // 2), m_align)
    return _Config(tm, tk, tl, Mp, Kp, Lp, Kp // tk)


# ---------------------------------------------------------------------------
# Wrapper.
# ---------------------------------------------------------------------------
def elastic_matmul(w, x, *, causal=False, compute_dtype=None,
                   block_m=None, block_l=None, block_k=None):
    """out[b] = (tril-masked) w @ x[b] via a Pallas TPU matmul.

    w: (M, K) interpolated weight; x: (B, K, L).  Returns (B, M, L).
    """
    B, K, L = x.shape
    M, Kw = w.shape
    assert Kw == K, f"weight inner dim {Kw} must match x features {K}"
    out_dtype = x.dtype

    if causal:
        # Mask once in the wrapper: O(F^2), negligible vs. the matmul, and it
        # removes all iota/compare/select work from the kernel body.
        w = jnp.tril(w)

    if compute_dtype is not None:
        w = w.astype(compute_dtype)
        x = x.astype(compute_dtype)
    cbytes = jnp.dtype(w.dtype).itemsize
    obytes = jnp.dtype(out_dtype).itemsize

    budget, vmem_limit = _default_budgets()
    cfg = _choose_tiles(M, K, L, cbytes, obytes, block_m=block_m,
                        block_l=block_l, block_k=block_k, budget=budget)

    # Zero-pad.  K padding is required for correctness of the reduction;
    # M / L padding is sliced off below.
    if cfg.Mp != M or cfg.Kp != K:
        w = jnp.pad(w, ((0, cfg.Mp - M), (0, cfg.Kp - K)))
    if cfg.Kp != K or cfg.Lp != L:
        x = jnp.pad(x, ((0, 0), (0, cfg.Kp - K), (0, cfg.Lp - L)))

    gm = cfg.Mp // cfg.tm
    gl = cfg.Lp // cfg.tl

    if cfg.k_steps == 1:
        grid = (gm, B, gl)
        kernel = _elastic_kernel_fullk
        in_specs = [
            pl.BlockSpec((cfg.tm, cfg.Kp), lambda i, b, j: (i, 0)),
            pl.BlockSpec((pl.Squeezed(), cfg.Kp, cfg.tl),
                         lambda i, b, j: (b, 0, j)),
        ]
        out_specs = pl.BlockSpec((pl.Squeezed(), cfg.tm, cfg.tl),
                                 lambda i, b, j: (b, i, j))
        scratch = []
        dims = ("parallel", "parallel", "parallel")
    else:
        grid = (gm, B, gl, cfg.k_steps)
        kernel = functools.partial(_elastic_kernel_ksplit,
                                   tm=cfg.tm, tk=cfg.tk, causal=causal)
        in_specs = [
            pl.BlockSpec((cfg.tm, cfg.tk), lambda i, b, j, k: (i, k)),
            pl.BlockSpec((pl.Squeezed(), cfg.tk, cfg.tl),
                         lambda i, b, j, k: (b, k, j)),
        ]
        out_specs = pl.BlockSpec((pl.Squeezed(), cfg.tm, cfg.tl),
                                 lambda i, b, j, k: (b, i, j))
        scratch = [pltpu.VMEM((cfg.tm, cfg.tl), jnp.float32)]
        dims = ("parallel", "parallel", "parallel", "arbitrary")

    out = pl.pallas_call(
        kernel,
        out_shape=jax.ShapeDtypeStruct((B, cfg.Mp, cfg.Lp), out_dtype),
        grid_spec=pltpu.PrefetchScalarGridSpec(
            num_scalar_prefetch=0,
            grid=grid,
            in_specs=in_specs,
            out_specs=out_specs,
            scratch_shapes=scratch,
        ),
        compiler_params=pltpu.CompilerParams(
            dimension_semantics=dims,
            vmem_limit_bytes=vmem_limit,
        ),
    )(w, x)

    if cfg.Mp != M or cfg.Lp != L:
        out = out[:, :M, :L]
    return out


# ---------------------------------------------------------------------------
# Weight interpolation (cheap O(F^2) glue, plain JAX).  Matches
# F.interpolate(weight[None], size=[target], mode='linear', align_corners=True).
# ---------------------------------------------------------------------------
def interpolate_weights(weight, target_features):
    _, bn = weight.shape
    if target_features == 1:
        pos = jnp.zeros((1,), jnp.float32)
    else:
        pos = jnp.arange(target_features, dtype=jnp.float32) * (
            (bn - 1) / (target_features - 1)
        )
    lo = jnp.floor(pos).astype(jnp.int32)
    hi = jnp.minimum(lo + 1, bn - 1)
    frac = pos - lo.astype(jnp.float32)
    return weight[:, lo] * (1.0 - frac)[None, :] + weight[:, hi] * frac[None, :]


class ElasticLinear:
    """JAX/Pallas re-implementation of the PyTorch ElasticLinear module."""

    def __init__(self, features, bottleneck=0.5, causal=False, *, key,
                 compute_dtype=None):
        self.causal = causal
        # compute_dtype=jnp.bfloat16 is recommended on v5e/v6e/v7x (bf16-native
        # MXU, halved HBM traffic); f32 is kept as the bit-exact default.
        self.compute_dtype = compute_dtype
        bottleneck_dim = int(features * bottleneck)
        bound = math.sqrt(6.0 / (features + bottleneck_dim))   # xavier_uniform_
        self.weight = jax.random.uniform(
            key, (features, bottleneck_dim), jnp.float32, -bound, bound
        )

    def __call__(self, x):
        _, features, _ = x.shape
        w = interpolate_weights(self.weight, features)
        return elastic_matmul(
            w, x, causal=self.causal, compute_dtype=self.compute_dtype
        )


if __name__ == "__main__":
    B, FEATURES, L = 2, 32, 16
    key = jax.random.PRNGKey(0)
    k_w, k_x = jax.random.split(key)
    x = jax.random.normal(k_x, (B, FEATURES, L), jnp.float32)

    layer = ElasticLinear(FEATURES, bottleneck=0.5, causal=False, key=k_w)
    w_full = interpolate_weights(layer.weight, FEATURES)
    ref = jnp.einsum("fk,bkl->bfl", w_full, x)

    # 1) f32, non-causal (full-K path, no accumulator).
    out = jax.block_until_ready(layer(x))
    np.testing.assert_allclose(np.asarray(out), np.asarray(ref),
                               rtol=1e-5, atol=1e-5)

    # 2) f32, causal (mask applied to W in the wrapper).
    layer_c = ElasticLinear(FEATURES, bottleneck=0.5, causal=True, key=k_w)
    out_c = jax.block_until_ready(layer_c(x))
    ref_c = jnp.einsum("fk,bkl->bfl", jnp.tril(w_full), x)
    np.testing.assert_allclose(np.asarray(out_c), np.asarray(ref_c),
                               rtol=1e-5, atol=1e-5)

    # 3) K-split path (accumulator + strictly-upper-tile skip), still small.
    F2, L2 = 160, 24
    x2 = jax.random.normal(jax.random.PRNGKey(1), (B, F2, L2), jnp.float32)
    layer2 = ElasticLinear(F2, bottleneck=0.5, causal=True, key=k_w)
    w2 = interpolate_weights(layer2.weight, F2)
    ref2 = jnp.einsum("fk,bkl->bfl", jnp.tril(w2), x2)
    out2 = jax.block_until_ready(
        elastic_matmul(w2, x2, causal=True, block_m=64, block_k=128))
    np.testing.assert_allclose(np.asarray(out2), np.asarray(ref2),
                               rtol=1e-4, atol=1e-4)

    # 4) bf16 compute path (f32 accumulation); relaxed tolerance.
    out_bf = jax.block_until_ready(
        elastic_matmul(w_full, x, causal=False, compute_dtype=jnp.bfloat16))
    np.testing.assert_allclose(np.asarray(out_bf), np.asarray(ref),
                               rtol=2e-2, atol=2e-2)

    print("KERNEL_OK")
</pallas_src>

<mosaic_0001>
module attributes {stable_mosaic.version = 11 : i64} {
  func.func @_elastic_kernel_fullk(%arg0: i32, %arg1: i32, %arg2: i32, %arg3: memref<32x128xf32, #tpu.memory_space<vmem>>, %arg4: memref<1x128x16xf32, #tpu.memory_space<vmem>>, %arg5: memref<1x32x16xf32, #tpu.memory_space<vmem>>) attributes {dimension_semantics = [#tpu.dimension_semantics<parallel>, #tpu.dimension_semantics<parallel>, #tpu.dimension_semantics<parallel>], iteration_bounds = array<i64: 1, 2, 1>, scalar_prefetch = 0 : i64, scratch_operands = 0 : i64, tpu.core_type = #tpu.core_type<tc>, window_params = [{transform_indices = @transform_0, window_bounds = array<i64: 32, 128>}, {transform_indices = @transform_1, window_bounds = array<i64: 1, 128, 16>}, {transform_indices = @transform_2, window_bounds = array<i64: 1, 32, 16>}]} {
    %c0 = arith.constant 0 : index
    %c0_0 = arith.constant 0 : index
    %0 = vector.load %arg3[%c0, %c0_0] : memref<32x128xf32, #tpu.memory_space<vmem>>, vector<32x128xf32>
    %c0_1 = arith.constant 0 : index
    %c0_2 = arith.constant 0 : index
    %c0_3 = arith.constant 0 : index
    %1 = vector.load %arg4[%c0_1, %c0_2, %c0_3] : memref<1x128x16xf32, #tpu.memory_space<vmem>>, vector<1x128x16xf32>
    %2 = vector.shape_cast %1 : vector<1x128x16xf32> to vector<128x16xf32>
    %cst = arith.constant dense<0.000000e+00> : vector<32x16xf32>
    %3 = tpu.matmul %0, %2, %cst {dimension_numbers = #tpu.dot_dimension_numbers<[1], [0], [0], [1], [0, 0, 1, 1], [], []>} : vector<32x128xf32>, vector<128x16xf32>, vector<32x16xf32> -> vector<32x16xf32>
    %c0_4 = arith.constant 0 : index
    %c0_5 = arith.constant 0 : index
    %c0_6 = arith.constant 0 : index
    %4 = vector.load %arg5[%c0_4, %c0_5, %c0_6] : memref<1x32x16xf32, #tpu.memory_space<vmem>>, vector<1x32x16xf32>
    %5 = vector.shape_cast %4 : vector<1x32x16xf32> to vector<32x16xf32>
    %6 = vector.shape_cast %3 : vector<32x16xf32> to vector<1x32x16xf32>
    tpu.vector_store %arg5[%c0_4, %c0_5, %c0_6], %6 {strides = array<i32>} : memref<1x32x16xf32, #tpu.memory_space<vmem>>, vector<1x32x16xf32>,
    return
  }
  func.func @transform_0(%arg0: i32, %arg1: i32, %arg2: i32) -> (i32, i32) {
    %c0_i32 = arith.constant 0 : i32
    %c0_i32_0 = arith.constant 0 : i32
    return %arg0, %c0_i32 : i32, i32
  }
  func.func @transform_1(%arg0: i32, %arg1: i32, %arg2: i32) -> (i32, i32, i32) {
    %c0_i32 = arith.constant 0 : i32
    %c0_i32_0 = arith.constant 0 : i32
    return %arg1, %c0_i32, %arg2 : i32, i32, i32
  }
  func.func @transform_2(%arg0: i32, %arg1: i32, %arg2: i32) -> (i32, i32, i32) {
    %c0_i32 = arith.constant 0 : i32
    return %arg1, %arg0, %arg2 : i32, i32, i32
  }
}

</mosaic_0001>

<bundles_post_ra>
// kernel: tpu_custom_call.1
= control target key start
LH: loop header
LB: loop body
LE: loop exit
PB: predicated region body
PF: predicated region fallthrough
CT: control target
= control target key end

     0   :  { %s509_s9 = smov 0   ;;  %s511_s10 = smov 0   ;;  %s576_s0 = inlined_call_operand.vmem [shape: f32[32,128], index: 0, kind: input, shape index: {}]   ;;  %s577_s1 = inlined_call_operand.vmem [shape: f32[2,128,16], index: 1, kind: input, shape index: {}]   ;;  %s578_s2 = inlined_call_operand.vmem [shape: f32[2,32,16], index: 2, kind: output, shape index: {}]  }
   0x1   :  { %s513_s11 = smov 0  }
   0x2 LB: > { %s27_s12 = sadd.s32 1, %s488_s10  ;;  %p389_p0 = scmp.ge.s32.totalorder %s492_s11, 1  ;;  %s492_s11 = sphi %s513_s11, %s12_s11   ;;  %s488_s10 = sphi %s511_s10, %s580_s10   ;;  %s484_s9 = sphi %s509_s9, %s579_s9  }
   0x3   : > { %p29_p1 = scmp.ge.s32.totalorder %s27_s12, 2  ;;  %p151_p2 = scmp.lt.s32.totalorder %s492_s11, 3 }
   0x5   : > { %s582_s12 = smov (%p29_p1, %s27_s12), 0  ;;  %p152_p3 = pnand %p389_p0, %p151_p2 }
   0x6   : > { %p194_p4 = scmp.lt.s32.totalorder (!%p152_p3), %s484_s9, 1 }
   0x7   : > { %155 = sbr.rel (%p152_p3) target bundleno = 181 (0xb5), region = 28 }
   0xc   : > { %s584_s9 = smov (!%p194_p4, %s484_s9), 1  ;;  %v217_v16 = vld [vmem:[%s576_s0 + $0x10] sm:$0xff]  ;;  %v218_v17 = vld [vmem:[%s576_s0 + $0x18] sm:$0xff]  ;;  %v215_v18 = vld [vmem:[%s576_s0] sm:$0xff]  ;;  %vm264_vm0 = vcmask 130048  }
   0xd   : > { %s396_s13 = sshll.u32 %s584_s9, 7  ;;  %v216_v19 = vld [vmem:[%s576_s0 + $0x8] sm:$0xff]  ;;  %s397_s25 = sshll.u32 %s584_s9, 5 }
   0xe   : > { %s533_s16 = scalar_lea.vmem %s577_s1, %s396_s13  ;;  %s213_s28 = scalar_lea.vmem %s578_s2, %s397_s25 }
   0xf   : > { %v234_v0 = vld [vmem:[%s533_s16 + $0x78] sm:$0xff]  ;;  %v233_v1 = vld [vmem:[%s533_s16 + $0x70] sm:$0xff]  ;;  %v232_v2 = vld [vmem:[%s533_s16 + $0x68] sm:$0xff] }
  0x10   : > { %399 = vmatpush.msra.mxu2 %v234_v0  ;;  %400 = vmatpush.msra.mxu3 %v234_v0  ;;  %v231_v3 = vld [vmem:[%s533_s16 + $0x60] sm:$0xff]  ;;  %v230_v4 = vld [vmem:[%s533_s16 + $0x58] sm:$0xff]  ;;  %v229_v5 = vld [vmem:[%s533_s16 + $0x50] sm:$0xff] }
  0x11   : > { %235 = vmatpush.msra.mxu0 %v234_v0  ;;  %398 = vmatpush.msra.mxu1 %v234_v0  ;;  %v228_v6 = vld [vmem:[%s533_s16 + $0x48] sm:$0xff]  ;;  %v227_v7 = vld [vmem:[%s533_s16 + $0x40] sm:$0xff]  ;;  %v226_v8 = vld [vmem:[%s533_s16 + $0x38] sm:$0xff] }
  0x12   : > { %402 = vmatpush.msra.mxu2 %v233_v1  ;;  %403 = vmatpush.msra.mxu3 %v233_v1  ;;  %v225_v9 = vld [vmem:[%s533_s16 + $0x30] sm:$0xff]  ;;  %v224_v10 = vld [vmem:[%s533_s16 + $0x28] sm:$0xff]  ;;  %v223_v11 = vld [vmem:[%s533_s16 + $0x20] sm:$0xff] }
  0x13   : > { %236 = vmatpush.msra.mxu0 %v233_v1  ;;  %401 = vmatpush.msra.mxu1 %v233_v1  ;;  %v222_v12 = vld [vmem:[%s533_s16 + $0x18] sm:$0xff]  ;;  %v221_v13 = vld [vmem:[%s533_s16 + $0x10] sm:$0xff]  ;;  %v220_v14 = vld [vmem:[%s533_s16 + $0x8] sm:$0xff] }
  0x14   : > { %405 = vmatpush.msra.mxu2 %v232_v2  ;;  %406 = vmatpush.msra.mxu3 %v232_v2  ;;  %v219_v15 = vld [vmem:[%s533_s16] sm:$0xff] }
  0x15   : > { %237 = vmatpush.msra.mxu0 %v232_v2  ;;  %404 = vmatpush.msra.mxu1 %v232_v2 }
  0x16   : > { %408 = vmatpush.msra.mxu2 %v231_v3  ;;  %409 = vmatpush.msra.mxu3 %v231_v3 }
  0x17   : > { %238 = vmatpush.msra.mxu0 %v231_v3  ;;  %407 = vmatpush.msra.mxu1 %v231_v3 }
  0x18   : > { %411 = vmatpush.msra.mxu2 %v230_v4  ;;  %412 = vmatpush.msra.mxu3 %v230_v4 }
  0x19   : > { %239 = vmatpush.msra.mxu0 %v230_v4  ;;  %410 = vmatpush.msra.mxu1 %v230_v4 }
  0x1a   : > { %414 = vmatpush.msra.mxu2 %v229_v5  ;;  %415 = vmatpush.msra.mxu3 %v229_v5 }
  0x1b   : > { %240 = vmatpush.msra.mxu0 %v229_v5  ;;  %413 = vmatpush.msra.mxu1 %v229_v5 }
  0x1c   : > { %417 = vmatpush.msra.mxu2 %v228_v6  ;;  %418 = vmatpush.msra.mxu3 %v228_v6 }
  0x1d   : > { %241 = vmatpush.msra.mxu0 %v228_v6  ;;  %416 = vmatpush.msra.mxu1 %v228_v6 }
  0x1e   : > { %420 = vmatpush.msra.mxu2 %v227_v7  ;;  %421 = vmatpush.msra.mxu3 %v227_v7 }
  0x1f   : > { %242 = vmatpush.msra.mxu0 %v227_v7  ;;  %419 = vmatpush.msra.mxu1 %v227_v7 }
  0x20   : > { %423 = vmatpush.msra.mxu2 %v226_v8  ;;  %424 = vmatpush.msra.mxu3 %v226_v8 }
  0x21   : > { %243 = vmatpush.msra.mxu0 %v226_v8  ;;  %422 = vmatpush.msra.mxu1 %v226_v8 }
  0x22   : > { %426 = vmatpush.msra.mxu2 %v225_v9  ;;  %427 = vmatpush.msra.mxu3 %v225_v9 }
  0x23   : > { %244 = vmatpush.msra.mxu0 %v225_v9  ;;  %425 = vmatpush.msra.mxu1 %v225_v9 }
  0x24   : > { %429 = vmatpush.msra.mxu2 %v224_v10  ;;  %430 = vmatpush.msra.mxu3 %v224_v10 }
  0x25   : > { %245 = vmatpush.msra.mxu0 %v224_v10  ;;  %428 = vmatpush.msra.mxu1 %v224_v10 }
  0x26   : > { %432 = vmatpush.msra.mxu2 %v223_v11  ;;  %433 = vmatpush.msra.mxu3 %v223_v11 }
  0x27   : > { %246 = vmatpush.msra.mxu0 %v223_v11  ;;  %431 = vmatpush.msra.mxu1 %v223_v11 }
  0x28   : > { %435 = vmatpush.msra.mxu2 %v222_v12  ;;  %436 = vmatpush.msra.mxu3 %v222_v12 }
  0x29   : > { %247 = vmatpush.msra.mxu0 %v222_v12  ;;  %434 = vmatpush.msra.mxu1 %v222_v12 }
  0x2a   : > { %438 = vmatpush.msra.mxu2 %v221_v13  ;;  %439 = vmatpush.msra.mxu3 %v221_v13 }
  0x2b   : > { %248 = vmatpush.msra.mxu0 %v221_v13  ;;  %437 = vmatpush.msra.mxu1 %v221_v13 }
  0x2c   : > { %441 = vmatpush.msra.mxu2 %v220_v14  ;;  %442 = vmatpush.msra.mxu3 %v220_v14 }
  0x2d   : > { %249 = vmatpush.msra.mxu0 %v220_v14  ;;  %440 = vmatpush.msra.mxu1 %v220_v14 }
  0x2e   : > { %444 = vmatpush.msra.mxu2 %v219_v15  ;;  %445 = vmatpush.msra.mxu3 %v219_v15 }
  0x2f   : > { %257 = vmatmul.f32.vlgmr.msra.gmra.mxu2 %v217_v16  ;;  %260 = vmatmul.f32.vlgmr.msra.gmra.mxu3 %v218_v17 }
  0x30   : > { %250 = vmatpush.msra.mxu0 %v219_v15  ;;  %443 = vmatpush.msra.mxu1 %v219_v15 }
  0x31   : > { %251 = vmatmul.f32.vlgmr.msra.gmra.mxu0 %v215_v18  ;;  %254 = vmatmul.f32.vlgmr.msra.gmra.mxu1 %v216_v19 }
  0xae   : > { %v252_v20 = vpop.f32.mrf.mxu0  ;;  %v255_v21 = vpop.f32.mrf.mxu1 }
  0xaf   : > { %265 = vst.msk [vmem:[%s213_s28] sm:$0xff] %vm264_vm0, %v252_v20 }
  0xb0   : > { %266 = vst.msk [vmem:[%s213_s28 + $0x8] sm:$0xff] %vm264_vm0, %v255_v21 }
  0xb2   : > { %v258_v22 = vpop.f32.mrf.mxu2  ;;  %v261_v23 = vpop.f32.mrf.mxu3 }
  0xb3   : > { %267 = vst.msk [vmem:[%s213_s28 + $0x10] sm:$0xff] %vm264_vm0, %v258_v22 }
  0xb4   : > { %268 = vst.msk [vmem:[%s213_s28 + $0x18] sm:$0xff] %vm264_vm0, %v261_v23 }
  0xb5 PF: > { %s12_s11 = sadd.s32 1, %s492_s11   ;;  %s579_s9 = smov %s488_s10 }
  0xb6   : > { %p9_p5 = scmp.ge.s32.totalorder %s12_s11, 4   ;;  %s580_s10 = smov %s582_s12 }
  0xb8   :  { %11 = sbr.rel (!%p9_p5) target bundleno = 2 (0x2), region = 61 }

</bundles_post_ra>
